<compile_context>
chip_gen: v5e
topology: v5e:2x2
jax: 0.10.0
libtpu: 0.0.40
codegen_flags: <defaults>
</compile_context>

<pallas_src>
import jax
import jax.numpy as jnp
from jax.experimental import pallas as pl
from jax.experimental.pallas import tpu as pltpu

LANE = 128  # TPU vreg lane width — pad Linear output dims to this.


def _round_up(v, m):
    return (v + m - 1) // m * m


def labelnet_kernel(adj_ref, x_ref, w1_ref, b1_ref, w2_ref, b2_ref, out_ref):
    """Bt graphs per grid step; all operands VMEM-resident.

    adj_ref: (Bt, N, N)     f32  (cast to bf16 here; exact for {0,1} entries)
    x_ref:   (Bt, N, F_in)  f32  (cast to bf16 here)
    w1_ref:  (F_in, H_pad)  bf16     b1_ref: (1, H_pad) f32
    w2_ref:  (H_pad, C_pad) bf16     b2_ref: (1, C_pad) f32
    out_ref: (Bt, N, C_pad) f32  (lane-dense store; wrapper slices classes out)
    """
    Bt, N, _ = adj_ref.shape

    adj = adj_ref[...].astype(jnp.bfloat16)   # in-kernel cast: free VPU work
    x = x_ref[...].astype(jnp.bfloat16)
    w1 = w1_ref[...]
    b1 = b1_ref[...]
    w2 = w2_ref[...]
    b2 = b2_ref[...]

    # --- GCN layer 1 ---------------------------------------------------------
    # Per-graph aggregation (copy_src + sum == dense A @ X), batched over Bt.
    agg1 = jnp.einsum('bij,bjf->bif', adj, x,
                      preferred_element_type=jnp.float32)        # (Bt, N, F_in) f32
    # Flatten graphs into one MXU pass for the Linear (fills the systolic array).
    h = jnp.dot(agg1.reshape(Bt * N, agg1.shape[-1]).astype(jnp.bfloat16), w1,
                preferred_element_type=jnp.float32)              # (Bt*N, H_pad) f32
    h = jnp.maximum(h + b1, 0.0)                                 # bias + ReLU (padded cols stay 0)

    # --- GCN layer 2 ---------------------------------------------------------
    agg2 = jnp.einsum('bij,bjh->bih', adj,
                      h.reshape(Bt, N, h.shape[-1]).astype(jnp.bfloat16),
                      preferred_element_type=jnp.float32)        # (Bt, N, H_pad) f32
    out = jnp.dot(agg2.reshape(Bt * N, agg2.shape[-1]).astype(jnp.bfloat16), w2,
                  preferred_element_type=jnp.float32) + b2       # (Bt*N, C_pad) f32

    out_ref[...] = out.reshape(Bt, N, out.shape[-1])             # lane-dense store


def labelnet_forward(adj, features, w1, b1, w2, b2, *, graphs_per_step=4):
    """Batched LabelNet forward.

    adj:      (B, N, N)  dense adjacency per graph (row i = messages into node i)
    features: (B, N, F_in)
    w1: (hidden, F_in)     b1: (hidden,)       -- native nn.Linear layout
    w2: (classes, hidden)  b2: (classes,)
    returns:  (B, N, classes) float32
    """
    B, N, f_in = features.shape
    hid = w1.shape[0]
    ncls = w2.shape[0]

    Bt = min(graphs_per_step, B)
    assert B % Bt == 0, "batch must be divisible by graphs_per_step"

    h_pad = _round_up(hid, LANE)
    c_pad = _round_up(ncls, LANE)

    # Tiny one-shot weight prep: transpose to (in, out), zero-pad output dims,
    # cast matmul operands to bf16.  Zero padding is inert through matmul,
    # bias-add and ReLU.  Adjacency / features are passed untouched (f32) and
    # cast inside the kernel.
    w1_p = jnp.pad(w1.T, ((0, 0), (0, h_pad - hid))).astype(jnp.bfloat16)
    b1_p = jnp.pad(b1.reshape(1, hid), ((0, 0), (0, h_pad - hid))).astype(jnp.float32)
    w2_p = jnp.pad(w2.T, ((0, hid and h_pad - hid if False else h_pad - hid), (0, c_pad - ncls))).astype(jnp.bfloat16)
    b2_p = jnp.pad(b2.reshape(1, ncls), ((0, 0), (0, c_pad - ncls))).astype(jnp.float32)

    adj_f = adj.astype(jnp.float32)
    x_f = features.astype(jnp.float32)

    out_padded = pl.pallas_call(
        labelnet_kernel,
        out_shape=jax.ShapeDtypeStruct((B, N, c_pad), jnp.float32),
        grid=(B // Bt,),
        in_specs=[
            pl.BlockSpec((Bt, N, N), lambda b: (b, 0, 0)),      # Bt adjacencies
            pl.BlockSpec((Bt, N, f_in), lambda b: (b, 0, 0)),   # Bt feature blocks (no lane pad)
            pl.BlockSpec((f_in, h_pad), lambda b: (0, 0)),      # shared weights / biases
            pl.BlockSpec((1, h_pad), lambda b: (0, 0)),
            pl.BlockSpec((h_pad, c_pad), lambda b: (0, 0)),
            pl.BlockSpec((1, c_pad), lambda b: (0, 0)),
        ],
        out_specs=pl.BlockSpec((Bt, N, c_pad), lambda b: (b, 0, 0)),
        compiler_params=pltpu.CompilerParams(
            # Batch-of-graphs axis is fully independent.  On v7x this could be
            # pltpu.CORE_PARALLEL to split steps across the 2 TensorCores.
            dimension_semantics=("parallel",),
        ),
    )(adj_f, x_f, w1_p, b1_p, w2_p, b2_p)

    return out_padded[:, :, :ncls]


def labelnet_reference_f32(adj, features, w1, b1, w2, b2):
    """Exact f32 batched reference (PyTorch module semantics, nn.Linear layout)."""
    h = jnp.matmul(adj, features)
    h = jnp.matmul(h, w1.T) + b1
    h = jnp.maximum(h, 0.0)
    h = jnp.matmul(adj, h)
    return jnp.matmul(h, w2.T) + b2


def labelnet_reference_bf16(adj, features, w1, b1, w2, b2):
    """Reference with the same bf16-operand / f32-accumulate casting as the kernel."""
    adj_b = adj.astype(jnp.bfloat16)
    h = jnp.matmul(adj_b, features.astype(jnp.bfloat16),
                   preferred_element_type=jnp.float32)
    h = jnp.matmul(h.astype(jnp.bfloat16), w1.T.astype(jnp.bfloat16),
                   preferred_element_type=jnp.float32)
    h = jnp.maximum(h + b1, 0.0)
    h = jnp.matmul(adj_b, h.astype(jnp.bfloat16),
                   preferred_element_type=jnp.float32)
    return jnp.matmul(h.astype(jnp.bfloat16), w2.T.astype(jnp.bfloat16),
                      preferred_element_type=jnp.float32) + b2


if __name__ == "__main__":
    # Shapes consistent with the module: in_node_features=8, hidden_gcn_size=32,
    # num_classes=4, N=16 nodes per graph, B=8 independent graphs, 4 per step.
    B, N, F_IN, HID, NCLS = 8, 16, 8, 32, 4

    key = jax.random.PRNGKey(0)
    k_adj, k_x, k_w1, k_b1, k_w2, k_b2 = jax.random.split(key, 6)

    # Deterministic random binary adjacencies (copy_src + sum: no normalization).
    adj = (jax.random.uniform(k_adj, (B, N, N)) < 0.25).astype(jnp.float32)
    features = jax.random.normal(k_x, (B, N, F_IN), dtype=jnp.float32)

    # Native nn.Linear parameter layout: W (out, in), b (out,).
    w1 = jax.random.normal(k_w1, (HID, F_IN), dtype=jnp.float32) * 0.1
    b1 = jax.random.normal(k_b1, (HID,), dtype=jnp.float32) * 0.1
    w2 = jax.random.normal(k_w2, (NCLS, HID), dtype=jnp.float32) * 0.1
    b2 = jax.random.normal(k_b2, (NCLS,), dtype=jnp.float32) * 0.1

    out = labelnet_forward(adj, features, w1, b1, w2, b2, graphs_per_step=4)
    out = jax.block_until_ready(out)
    assert out.shape == (B, N, NCLS)

    # Tight check against a reference using the same bf16/f32 casting...
    ref_bf16 = labelnet_reference_bf16(adj, features, w1, b1, w2, b2)
    assert jnp.allclose(out, ref_bf16, atol=1e-2, rtol=1e-2)
    # ...and a looser check against the exact f32 module semantics.
    # NOTE: bf16 operand casts lose ~3 decimal digits; for normalized / large
    # adjacencies keep the f32 path or tighten dtypes upstream.
    ref_f32 = labelnet_reference_f32(adj, features, w1, b1, w2, b2)
    assert jnp.allclose(out, ref_f32, atol=5e-2, rtol=5e-2)

    print("KERNEL_OK")
</pallas_src>

<mosaic_0001>
module attributes {stable_mosaic.version = 11 : i64} {
  func.func @labelnet_kernel(%arg0: i32, %arg1: memref<4x16x16xf32, #tpu.memory_space<vmem>>, %arg2: memref<4x16x8xf32, #tpu.memory_space<vmem>>, %arg3: memref<8x128xbf16, #tpu.memory_space<vmem>>, %arg4: memref<1x128xf32, #tpu.memory_space<vmem>>, %arg5: memref<128x128xbf16, #tpu.memory_space<vmem>>, %arg6: memref<1x128xf32, #tpu.memory_space<vmem>>, %arg7: memref<4x16x128xf32, #tpu.memory_space<vmem>>) attributes {dimension_semantics = [#tpu.dimension_semantics<parallel>], iteration_bounds = array<i64: 2>, scalar_prefetch = 0 : i64, scratch_operands = 0 : i64, tpu.core_type = #tpu.core_type<tc>, window_params = [{transform_indices = @transform_0, window_bounds = array<i64: 4, 16, 16>}, {transform_indices = @transform_1, window_bounds = array<i64: 4, 16, 8>}, {pipeline_mode = #tpu.pipeline_mode<synchronous>, transform_indices = @transform_2, window_bounds = array<i64: 8, 128>}, {pipeline_mode = #tpu.pipeline_mode<synchronous>, transform_indices = @transform_3, window_bounds = array<i64: 1, 128>}, {pipeline_mode = #tpu.pipeline_mode<synchronous>, transform_indices = @transform_4, window_bounds = array<i64: 128, 128>}, {pipeline_mode = #tpu.pipeline_mode<synchronous>, transform_indices = @transform_5, window_bounds = array<i64: 1, 128>}, {transform_indices = @transform_6, window_bounds = array<i64: 4, 16, 128>}]} {
    %c0 = arith.constant 0 : index
    %c0_0 = arith.constant 0 : index
    %c0_1 = arith.constant 0 : index
    %0 = vector.load %arg1[%c0, %c0_0, %c0_1] : memref<4x16x16xf32, #tpu.memory_space<vmem>>, vector<4x16x16xf32>
    %1 = arith.truncf %0 : vector<4x16x16xf32> to vector<4x16x16xbf16>
    %c0_2 = arith.constant 0 : index
    %c0_3 = arith.constant 0 : index
    %c0_4 = arith.constant 0 : index
    %2 = vector.load %arg2[%c0_2, %c0_3, %c0_4] : memref<4x16x8xf32, #tpu.memory_space<vmem>>, vector<4x16x8xf32>
    %3 = arith.truncf %2 : vector<4x16x8xf32> to vector<4x16x8xbf16>
    %c0_5 = arith.constant 0 : index
    %c0_6 = arith.constant 0 : index
    %4 = vector.load %arg3[%c0_5, %c0_6] : memref<8x128xbf16, #tpu.memory_space<vmem>>, vector<8x128xbf16>
    %c0_7 = arith.constant 0 : index
    %c0_8 = arith.constant 0 : index
    %5 = vector.load %arg4[%c0_7, %c0_8] : memref<1x128xf32, #tpu.memory_space<vmem>>, vector<1x128xf32>
    %c0_9 = arith.constant 0 : index
    %c0_10 = arith.constant 0 : index
    %6 = vector.load %arg5[%c0_9, %c0_10] : memref<128x128xbf16, #tpu.memory_space<vmem>>, vector<128x128xbf16>
    %c0_11 = arith.constant 0 : index
    %c0_12 = arith.constant 0 : index
    %7 = vector.load %arg6[%c0_11, %c0_12] : memref<1x128xf32, #tpu.memory_space<vmem>>, vector<1x128xf32>
    "tpu.trace_start"() <{level = 10 : i32, message = "bij,bjf->bif"}> : () -> ()
    %cst = arith.constant dense<0.000000e+00> : vector<4x16x8xf32>
    %8 = tpu.matmul %1, %3, %cst {dimension_numbers = #tpu.dot_dimension_numbers<[2], [1], [1], [2], [0, 0, 0, 1, 1, 2], [0], [0]>} : vector<4x16x16xbf16>, vector<4x16x8xbf16>, vector<4x16x8xf32> -> vector<4x16x8xf32>
    "tpu.trace_stop"() : () -> ()
    %9 = vector.shape_cast %8 : vector<4x16x8xf32> to vector<64x8xf32>
    %10 = arith.truncf %9 : vector<64x8xf32> to vector<64x8xbf16>
    %cst_13 = arith.constant dense<0.000000e+00> : vector<64x128xf32>
    %11 = tpu.matmul %10, %4, %cst_13 {dimension_numbers = #tpu.dot_dimension_numbers<[1], [0], [0], [1], [0, 0, 1, 1], [], []>} : vector<64x8xbf16>, vector<8x128xbf16>, vector<64x128xf32> -> vector<64x128xf32>
    %12 = vector.broadcast %5 : vector<1x128xf32> to vector<64x128xf32>
    %13 = arith.addf %11, %12 : vector<64x128xf32>
    %cst_14 = arith.constant 0.000000e+00 : f32
    %14 = vector.broadcast %cst_14 : f32 to vector<64x128xf32>
    %15 = arith.maximumf %13, %14 : vector<64x128xf32>
    %16 = vector.shape_cast %15 : vector<64x128xf32> to vector<4x16x128xf32>
    %17 = arith.truncf %16 : vector<4x16x128xf32> to vector<4x16x128xbf16>
    "tpu.trace_start"() <{level = 10 : i32, message = "bij,bjh->bih"}> : () -> ()
    %cst_15 = arith.constant dense<0.000000e+00> : vector<4x16x128xf32>
    %18 = tpu.matmul %1, %17, %cst_15 {dimension_numbers = #tpu.dot_dimension_numbers<[2], [1], [1], [2], [0, 0, 0, 1, 1, 2], [0], [0]>} : vector<4x16x16xbf16>, vector<4x16x128xbf16>, vector<4x16x128xf32> -> vector<4x16x128xf32>
    "tpu.trace_stop"() : () -> ()
    %19 = vector.shape_cast %18 : vector<4x16x128xf32> to vector<64x128xf32>
    %20 = arith.truncf %19 : vector<64x128xf32> to vector<64x128xbf16>
    %cst_16 = arith.constant dense<0.000000e+00> : vector<64x128xf32>
    %21 = tpu.matmul %20, %6, %cst_16 {dimension_numbers = #tpu.dot_dimension_numbers<[1], [0], [0], [1], [0, 0, 1, 1], [], []>} : vector<64x128xbf16>, vector<128x128xbf16>, vector<64x128xf32> -> vector<64x128xf32>
    %22 = vector.broadcast %7 : vector<1x128xf32> to vector<64x128xf32>
    %23 = arith.addf %21, %22 : vector<64x128xf32>
    %24 = vector.shape_cast %23 : vector<64x128xf32> to vector<4x16x128xf32>
    %c0_17 = arith.constant 0 : index
    %c0_18 = arith.constant 0 : index
    %c0_19 = arith.constant 0 : index
    %25 = vector.load %arg7[%c0_17, %c0_18, %c0_19] : memref<4x16x128xf32, #tpu.memory_space<vmem>>, vector<4x16x128xf32>
    tpu.vector_store %arg7[%c0_17, %c0_18, %c0_19], %24 {strides = array<i32>} : memref<4x16x128xf32, #tpu.memory_space<vmem>>, vector<4x16x128xf32>,
    return
  }
  func.func @transform_0(%arg0: i32) -> (i32, i32, i32) {
    %c0_i32 = arith.constant 0 : i32
    %c0_i32_0 = arith.constant 0 : i32
    %c0_i32_1 = arith.constant 0 : i32
    return %arg0, %c0_i32, %c0_i32_0 : i32, i32, i32
  }
  func.func @transform_1(%arg0: i32) -> (i32, i32, i32) {
    %c0_i32 = arith.constant 0 : i32
    %c0_i32_0 = arith.constant 0 : i32
    %c0_i32_1 = arith.constant 0 : i32
    return %arg0, %c0_i32, %c0_i32_0 : i32, i32, i32
  }
  func.func @transform_2(%arg0: i32) -> (i32, i32) {
    %c0_i32 = arith.constant 0 : i32
    %c0_i32_0 = arith.constant 0 : i32
    %c0_i32_1 = arith.constant 0 : i32
    return %c0_i32, %c0_i32_0 : i32, i32
  }
  func.func @transform_3(%arg0: i32) -> (i32, i32) {
    %c0_i32 = arith.constant 0 : i32
    %c0_i32_0 = arith.constant 0 : i32
    %c0_i32_1 = arith.constant 0 : i32
    return %c0_i32, %c0_i32_0 : i32, i32
  }
  func.func @transform_4(%arg0: i32) -> (i32, i32) {
    %c0_i32 = arith.constant 0 : i32
    %c0_i32_0 = arith.constant 0 : i32
    %c0_i32_1 = arith.constant 0 : i32
    return %c0_i32, %c0_i32_0 : i32, i32
  }
  func.func @transform_5(%arg0: i32) -> (i32, i32) {
    %c0_i32 = arith.constant 0 : i32
    %c0_i32_0 = arith.constant 0 : i32
    %c0_i32_1 = arith.constant 0 : i32
    return %c0_i32, %c0_i32_0 : i32, i32
  }
  func.func @transform_6(%arg0: i32) -> (i32, i32, i32) {
    %c0_i32 = arith.constant 0 : i32
    %c0_i32_0 = arith.constant 0 : i32
    %c0_i32_1 = arith.constant 0 : i32
    return %arg0, %c0_i32, %c0_i32_0 : i32, i32, i32
  }
}

</mosaic_0001>

<bundles_post_ra>
// kernel: tpu_custom_call.1
= control target key start
LH: loop header
LB: loop body
LE: loop exit
PB: predicated region body
PF: predicated region fallthrough
CT: control target
= control target key end

     0   :  { %11 = vsyncpa [#allocation3], 0  ;;  %s1233_s0 = inlined_call_operand.vmem [shape: f32[8,16,16], index: 0, kind: input, shape index: {}]   ;;  %s1234_s1 = inlined_call_operand.vmem [shape: f32[8,16,8], index: 1, kind: input, shape index: {}]   ;;  %s1235_s2 = inlined_call_operand.hbm [shape: bf16[8,128], index: 2, kind: input, shape index: {}]   ;;  %s1236_s3 = inlined_call_operand.vmem [shape: f32[1,128], index: 3, kind: input, shape index: {}]   ;;  %s1237_s4 = inlined_call_operand.vmem [shape: bf16[128,128], index: 4, kind: input, shape index: {}]   ;;  %s1238_s5 = inlined_call_operand.vmem [shape: f32[1,128], index: 5, kind: input, shape index: {}]   ;;  %s1239_s6 = inlined_call_operand.hbm [shape: f32[8,16,128], index: 6, kind: output, shape index: {}]  }
   0x1   :  { %12 = vsyncpa [#allocation4], 0 }
   0x2   :  { %14 = vsyncpa [#allocation4 + $0x1], 0  ;;  %s1078_s21 = smov 0   ;;  %s1080_s22 = smov 0  }
   0x3   :  { %s1082_s23 = smov 0   ;;  %s1084_s24 = smov 0  }
   0x4 LB: > { %s1099_s25 = sadd.s32 4294967295, %s1038_s24   ;;  %s805_s26 = sadd.s32 4294967294, %s1038_s24   ;;  %s1038_s24 = sphi %s1084_s24, %s1245_s24   ;;  %s1034_s23 = sphi %s1082_s23, %s1244_s23   ;;  %s1030_s22 = sphi %s1080_s22, %s1243_s22   ;;  %s1026_s21 = sphi %s1078_s21, %s1242_s21  }
   0x5   : > { %s1103_s27 = sadd.s32 1, %s1038_s24   ;;  %s163_s28 = sadd.s32 1, %s1034_s23 }
   0x6   : > { %s160_s29 = ssub.s32 %s1038_s24, %s1103_s27  ;;  %p173_p0 = scmp.ne.s32.totalorder %s1034_s23, %s1030_s22 }
   0x7   : > { %p161_p1 = scmp.eq.s32.totalorder %s160_s29, 0  ;;  %p174_p2 = scmp.eq.s32.totalorder %s1099_s25, 1 }
   0x8   : > { %p179_p3 = scmp.ne.s32.totalorder %s1030_s22, %s1026_s21  ;;  %p180_p4 = scmp.eq.s32.totalorder %s805_s26, 1 }
   0x9   : > { %s1114_s30 = scalar_select %p161_p1, %s1034_s23, %s163_s28  }
   0xa   : > { %p1116_p5 = por %p174_p2, %p173_p0  ;;  %p1120_p6 = por %p180_p4, %p179_p3 }
   0xb   : > { %p806_p7 = scmp.ge.s32.totalorder %s1038_s24, 1  ;;  %p187_p8 = scmp.lt.s32.totalorder %s1038_s24, 3 }
   0xc   : > { %p902_p9 = scmp.eq.s32.totalorder %s1099_s25, 0  ;;  %s199_s11 = sshll.u32 %s1235_s2, 4  ;;  %s200_s11 = int_to_ptr.hbm [resolvable:$true] %s199_s11 }
   0xd   : > { %p188_p10 = pnand %p806_p7, %p187_p8  ;;  %s1040_s12 = smov [#allocation2]  }
   0xe   : > { %s201_s13 = sshll.u32 %s1040_s12, 4  ;;  %s202_s13 = int_to_ptr.vmem [resolvable:$true] %s201_s13 }
   0xf   : > { %p894_p11 = pneg %p188_p10  ;;  %243 = sbr.rel (%p188_p10) target bundleno = 656 (0x290), region = 44 }
  0x11   : > { %p895_p12 = pnand %p902_p9, %p894_p11 }
  0x13   : > { %897 = dma.hbm_to_vmem [thread:$0]  (!%p895_p12), %s200_s11, 64, %s202_s13, [#allocation3]  }
  0x14   : > { %1017 = dma.done.wait (%p902_p9), [#allocation3], 64  }
  0x15   : > { %1019 = vsyncadd (%p902_p9), [#allocation3], 4294967232  ;;  %s812_s14 = sshll.u32 %s1099_s25, 2  ;;  %vm359_vm0 = vcmask 130048   ;;  %v329_v56 = vld [vmem:[#allocation2] sm:$0xf] }
  0x16   : > { %p282_p13 = scmp.lt.s32.totalorder %s812_s14, 7  ;;  %vm481_vm1 = vcmask 1043456   ;;  %vm468_vm2 = vcmask 64512   ;;  %s278_s10 = sand.u32 1, %s1030_s22  }
  0x17   : > { %v483_v57 = vsel %vm481_vm1, %v329_v56, 0  ;;  %s811_s11 = sshll.u32 %s278_s10, 6 }
  0x18   : > { %s1247_s14 = smov (!%p282_p13, %s812_s14), 7  ;;  %492 = vmatpush.bf16.msra.mxu0 %v483_v57 }
  0x19   : > { %s868_s15 = sshll.u32 %s1247_s14, 4  ;;  %s280_s14 = scalar_lea.vmem [#allocation5], %s811_s11 }
  0x1a   : > { %s1134_s18 = scalar_lea.vmem %s1233_s0, %s868_s15  ;;  %s293_s26 = scalar_lea.vmem %s1234_s1, %s868_s15 }
  0x1b   : > { %v313_v0 = vld [vmem:[%s293_s26] sm:$0xff]  ;;  %v314_v1 = vld [vmem:[%s293_s26 + $0x8] sm:$0xff]  ;;  %v315_v7 = vld [vmem:[%s293_s26 + $0x10] sm:$0xff]  ;;  %s879_s15 = sshll.u32 %s1099_s25, 6  ;;  %s716_s19 = sshll.u32 %s280_s14, 4  ;;  %s717_s19 = int_to_ptr.vmem [resolvable:$true] %s716_s19 }
  0x1c   : > { %v297_v2 = vld [vmem:[%s1134_s18] sm:$0xff]  ;;  %v321_v3 = vpack.c.bf16 %v313_v0, %v313_v0  ;;  %v322_v4 = vpack.c.bf16 %v314_v1, %v314_v1  ;;  %v298_v5 = vld [vmem:[%s1134_s18 + $0x8] sm:$0xff]  ;;  %v316_v8 = vld [vmem:[%s293_s26 + $0x18] sm:$0xff]  ;;  %v323_v10 = vpack.c.bf16 %v315_v7, %v315_v7  ;;  %s992_s11 = scalar_lea.hbm %s1239_s6, 128 }
  0x1d   : > { %v305_v6 = vpack.c.bf16 %v297_v2, %v297_v2  ;;  %v306_v9 = vpack.c.bf16 %v298_v5, %v298_v5  ;;  %v324_v11 = vpack.c.bf16 %v316_v8, %v316_v8  ;;  %v317_v12 = vld [vmem:[%s293_s26 + $0x20] sm:$0xff]  ;;  %v318_v13 = vld [vmem:[%s293_s26 + $0x28] sm:$0xff]  ;;  %v319_v24 = vld [vmem:[%s293_s26 + $0x30] sm:$0xff] }
  0x1e   : > { %v355_v14 = vunpack.c.l.b16 %v321_v3  ;;  %v356_v15 = vunpack.c.l.b16 %v322_v4  ;;  %v325_v17 = vpack.c.bf16 %v317_v12, %v317_v12  ;;  %v301_v18 = vld [vmem:[%s1134_s18 + $0x20] sm:$0xff]  ;;  %v384_v20 = vunpack.c.l.b16 %v323_v10  ;;  %v302_v23 = vld [vmem:[%s1134_s18 + $0x28] sm:$0xff]  ;;  %v320_v25 = vld [vmem:[%s293_s26 + $0x38] sm:$0xff]  ;;  %s703_s26 = scalar_lea.sflag [#allocation4], %s278_s10 }
  0x1f   : > { %v350_v16 = vunpack.c.l.b16 %v305_v6  ;;  %v351_v19 = vunpack.c.l.b16 %v306_v9  ;;  %v385_v21 = vunpack.c.l.b16 %v324_v11  ;;  %v326_v22 = vpack.c.bf16 %v318_v13, %v318_v13  ;;  %v303_v28 = vld [vmem:[%s1134_s18 + $0x30] sm:$0xff]  ;;  %v304_v33 = vld [vmem:[%s1134_s18 + $0x38] sm:$0xff]  ;;  %v940_v6 = vld [vmem:[%s1236_s3] ss:$0 sm:$0xff] }
  0x20   : > { %v357_v26 = vpack.c.b16 %v356_v15, %v355_v14  ;;  %v412_v27 = vunpack.c.l.b16 %v325_v17  ;;  %v309_v32 = vpack.c.bf16 %v301_v18, %v301_v18  ;;  %v310_v34 = vpack.c.bf16 %v302_v23, %v302_v23  ;;  %v299_v45 = vld [vmem:[%s1134_s18 + $0x10] sm:$0xff]  ;;  %v300_v46 = vld [vmem:[%s1134_s18 + $0x18] sm:$0xff]  ;;  %s715_s18 = scalar_lea.hbm %s1239_s6, %s879_s15 }
  0x21   : > { %v1144_v29 = vpack.c.b16 %v351_v19, %v350_v16  ;;  %v386_v30 = vpack.c.b16 %v385_v21, %v384_v20  ;;  %v413_v31 = vunpack.c.l.b16 %v326_v22  ;;  %v327_v35 = vpack.c.bf16 %v319_v24, %v319_v24  ;;  %s718_s20 = sshll.u32 %s715_s18, 4  ;;  %s719_s20 = int_to_ptr.hbm [resolvable:$true] %s718_s20 }
  0x22   : > { %370 = vmatpush.bf16.msra.mxu1 %v357_v26  ;;  %v407_v37 = vunpack.c.l.b16 %v309_v32  ;;  %v328_v38 = vpack.c.bf16 %v320_v25, %v320_v25  ;;  %v311_v39 = vpack.c.bf16 %v303_v28, %v303_v28  ;;  %v408_v40 = vunpack.c.l.b16 %v310_v34  ;;  %v877_v32 = vld [vmem:[%s1237_s4 + $0x38] sm:$0xff]  ;;  %v876_v34 = vld [vmem:[%s1237_s4 + $0x30] sm:$0xff]  ;;  %s986_s28 = sshra.s32 %s719_s20, 4  ;;  %s987_s28 = int_to_ptr.hbm [resolvable:$true] %s986_s28 }
  0x23   : > { %v414_v36 = vpack.c.b16 %v413_v31, %v412_v27  ;;  %v440_v41 = vunpack.c.l.b16 %v327_v35  ;;  %v312_v42 = vpack.c.bf16 %v304_v33, %v304_v33  ;;  %v307_v51 = vpack.c.bf16 %v299_v45, %v299_v45  ;;  %s988_s25 = scalar_lea.hbm %s987_s28, 64  ;;  %p993_p3 = scmp.lt.s32.totalorder %s987_s28, %s1239_s6 }
  0x24   : > { %v441_v43 = vunpack.c.l.b16 %v328_v38  ;;  %v435_v44 = vunpack.c.l.b16 %v311_v39  ;;  %v1151_v47 = vpack.c.b16 %v408_v40, %v407_v37  ;;  %v308_v52 = vpack.c.bf16 %v300_v46, %v300_v46  ;;  %v875_v38 = vld [vmem:[%s1237_s4 + $0x28] sm:$0xff]  ;;  %v873_v46 = vld [vmem:[%s1237_s4 + $0x18] sm:$0xff]  ;;  %p989_p0 = scmp.ne.s32.totalorder %s987_s28, %s988_s25  ;;  %p994_p4 = scmp.lt.s32.totalorder %s992_s11, %s988_s25 }
  0x25   : > { %818 = vmatmul.msk.bf16.vlgmr.msra.gmra.mxu1 %vm359_vm0, %v1144_v29  ;;  %426 = vmatpush.bf16.msra.mxu2 %v414_v36  ;;  %v436_v48 = vunpack.c.l.b16 %v312_v42  ;;  %v379_v53 = vunpack.c.l.b16 %v307_v51 }
  0x26   : > { %398 = vmatpush.bf16.msrb.mxu1 %v386_v30  ;;  %v442_v49 = vpack.c.b16 %v441_v43, %v440_v41  ;;  %v380_v54 = vunpack.c.l.b16 %v308_v52  ;;  %v874_v43 = vld [vmem:[%s1237_s4 + $0x20] sm:$0xff]  ;;  %p990_p1 = pnand %p989_p0, %p1116_p5  ;;  %p995_p7 = por %p994_p4, %p993_p3 }
  0x27   : > { %v1155_v50 = vpack.c.b16 %v436_v48, %v435_v44 }
  0x28   : > { %820 = vmatmul.msk.bf16.vlgmr.msra.gmra.mxu2 %vm359_vm0, %v1151_v47  ;;  %454 = vmatpush.bf16.msra.mxu3 %v442_v49  ;;  %v381_v55 = vpack.c.b16 %v380_v54, %v379_v53  ;;  %p991_p2 = pneg %p990_p1 }
  0x2a   : > { %p996_p8 = pnand %p995_p7, %p991_p2 }
  0x2b   : > { %821 = vmatmul.msk.bf16.vlgmr.msra.gmra.mxu3 %vm359_vm0, %v1155_v50 }
  0x35   : > { %819 = vmatmul.msk.bf16.vlgmr.msrb.gmra.mxu1 %vm359_vm0, %v381_v55 }
  0xa2   : > { %v372_v58 = vpop.f32.mrf.mxu1 }
  0xaa   : > { %v374_v59 = vpop.f32.mrf.mxu1 }
  0xab   : > { %v461_v60 = vpack.c.bf16 %v374_v59, %v372_v58  ;;  %v428_v0 = vpop.f32.mrf.mxu2  ;;  %v871_v58 = vld [vmem:[%s1237_s4 + $0x8] sm:$0xff]  ;;  %v870_v59 = vld [vmem:[%s1237_s4] sm:$0xff] }
  0xad   : > { %822 = vmatmul.msk.bf16.vlgmr.msra.gmra.mxu0 %vm468_vm2, %v461_v60 }
  0xae   : > { %v456_v3 = vpop.f32.mrf.mxu3 }
  0xb2   : > { %v400_v61 = vpop.f32.mrf.mxu1 }
  0xb3   : > { %v430_v1 = vpop.f32.mrf.mxu2 }
  0xb4   : > { %v463_v2 = vpack.c.bf16 %v430_v1, %v428_v0 }
  0xb6   : > { %v458_v4 = vpop.f32.mrf.mxu3 }
  0xb7   : > { %v464_v5 = vpack.c.bf16 %v458_v4, %v456_v3 }
  0xba   : > { %v402_v62 = vpop.f32.mrf.mxu1 }
  0xbb   : > { %v462_v63 = vpack.c.bf16 %v402_v62, %v400_v61 }
  0xbd   : > { %823 = vmatmul.msk.bf16.gmra.mxu0 %vm468_vm2, %v462_v63 }
  0xcd   : > { %824 = vmatmul.msk.bf16.gmra.mxu0 %vm468_vm2, %v463_v2 }
  0xdd   : > { %825 = vmatmul.msk.bf16.gmra.mxu0 %vm468_vm2, %v464_v5 }
 0x12a   : > { %v494_v7 = vpop.f32.mrf.mxu0 }
 0x12b   : > { %v495_v8 = vadd.f32 %v940_v6, %v494_v7  ;;  %v941_v7 = vld [vmem:[%s1238_s5] ss:$0 sm:$0xff] }
 0x12d   : > { %v514_v9 = vmax.f32 %v495_v8, 0.0 }
 0x12f   : > { %v522_v12 = vpack.c.bf16 %v514_v9, %v514_v9 }
 0x131   : > { %v532_v15 = vunpack.c.l.b16 %v522_v12 }
 0x132   : > { %v496_v10 = vpop.f32.mrf.mxu0 }
 0x133   : > { %v497_v11 = vadd.f32 %v940_v6, %v496_v10 }
 0x135   : > { %v515_v13 = vmax.f32 %v497_v11, 0.0 }
 0x137   : > { %v523_v14 = vpack.c.bf16 %v515_v13, %v515_v13 }
 0x139   : > { %v533_v16 = vunpack.c.l.b16 %v523_v14 }
 0x13a   : > { %v499_v17 = vpop.f32.mrf.mxu0 }
 0x13b   : > { %v534_v18 = vpack.c.b16 %v533_v16, %v532_v15  ;;  %v500_v19 = vadd.f32 %v940_v6, %v499_v17 }
 0x13d   : > { %543 = vmatpush.bf16.msra.mxu1 %v534_v18  ;;  %v516_v20 = vmax.f32 %v500_v19, 0.0 }
 0x13f   : > { %v524_v23 = vpack.c.bf16 %v516_v20, %v516_v20 }
 0x140   : > { %826 = vmatmul.msk.bf16.vlgmr.msra.gmra.mxu1 %vm359_vm0, %v1144_v29 }
 0x141   : > { %v552_v26 = vunpack.c.l.b16 %v524_v23 }
 0x142   : > { %v501_v21 = vpop.f32.mrf.mxu0 }
 0x143   : > { %v502_v22 = vadd.f32 %v940_v6, %v501_v21 }
 0x145   : > { %v517_v24 = vmax.f32 %v502_v22, 0.0 }
 0x147   : > { %v525_v25 = vpack.c.bf16 %v517_v24, %v517_v24 }
 0x149   : > { %v553_v27 = vunpack.c.l.b16 %v525_v25 }
 0x14a   : > { %v504_v28 = vpop.f32.mrf.mxu0 }
 0x14b   : > { %v554_v30 = vpack.c.b16 %v553_v27, %v552_v26  ;;  %v505_v31 = vadd.f32 %v940_v6, %v504_v28 }
 0x14d   : > { %563 = vmatpush.bf16.msrb.mxu2 %v554_v30  ;;  %v518_v33 = vmax.f32 %v505_v31, 0.0 }
 0x14f   : > { %v526_v36 = vpack.c.bf16 %v518_v33, %v518_v33 }
 0x150   : > { %827 = vmatmul.msk.bf16.vlgmr.msrb.gmra.mxu2 %vm359_vm0, %v381_v55 }
 0x151   : > { %665 = vmatpush.bf16.msra.mxu2 %v877_v32  ;;  %v572_v40 = vunpack.c.l.b16 %v526_v36 }
 0x152   : > { %v506_v29 = vpop.f32.mrf.mxu0 }
 0x153   : > { %v507_v35 = vadd.f32 %v940_v6, %v506_v29 }
 0x155   : > { %v519_v37 = vmax.f32 %v507_v35, 0.0  ;;  %666 = vmatpush.bf16.msra.mxu2 %v876_v34 }
 0x157   : > { %v527_v39 = vpack.c.bf16 %v519_v37, %v519_v37 }
 0x159   : > { %v573_v41 = vunpack.c.l.b16 %v527_v39  ;;  %667 = vmatpush.bf16.msra.mxu2 %v875_v38 }
 0x15a   : > { %v509_v42 = vpop.f32.mrf.mxu0 }
 0x15b   : > { %v574_v44 = vpack.c.b16 %v573_v41, %v572_v40  ;;  %v510_v45 = vadd.f32 %v940_v6, %v509_v42 }
 0x15d   : > { %583 = vmatpush.bf16.msrb.mxu3 %v574_v44  ;;  %668 = vmatpush.bf16.msra.mxu2 %v874_v43  ;;  %v520_v48 = vmax.f32 %v510_v45, 0.0 }
 0x15f   : > { %v528_v52 = vpack.c.bf16 %v520_v48, %v520_v48 }
 0x160   : > { %828 = vmatmul.msk.bf16.vlgmr.msrb.gmra.mxu3 %vm359_vm0, %v1151_v47  ;;  %v872_v47 = vld [vmem:[%s1237_s4 + $0x10] sm:$0xff] }
 0x161   : > { %880 = vmatpush.bf16.msra.mxu3 %v877_v32  ;;  %669 = vmatpush.bf16.msra.mxu2 %v873_v46  ;;  %v592_v55 = vunpack.c.l.b16 %v528_v52 }
 0x162   : > { %v511_v49 = vpop.f32.mrf.mxu0 }
 0x163   : > { %v512_v51 = vadd.f32 %v940_v6, %v511_v49 }
 0x165   : > { %881 = vmatpush.bf16.msra.mxu3 %v876_v34  ;;  %v521_v53 = vmax.f32 %v512_v51, 0.0  ;;  %670 = vmatpush.bf16.msra.mxu2 %v872_v47 }
 0x167   : > { %v529_v54 = vpack.c.bf16 %v521_v53, %v521_v53 }
 0x169   : > { %882 = vmatpush.bf16.msra.mxu3 %v875_v38  ;;  %v593_v56 = vunpack.c.l.b16 %v529_v54  ;;  %671 = vmatpush.bf16.msra.mxu2 %v871_v58 }
 0x16b   : > { %v594_v57 = vpack.c.b16 %v593_v56, %v592_v55 }
 0x16d   : > { %883 = vmatpush.bf16.msra.mxu3 %v874_v43  ;;  %603 = vmatpush.bf16.msrb.mxu1 %v594_v57 }
 0x16e   : > { %672 = vmatpush.bf16.msra.mxu2 %v870_v59 }
 0x170   : > { %829 = vmatmul.msk.bf16.vlgmr.msrb.gmra.mxu1 %vm359_vm0, %v1155_v50 }
 0x171   : > { %884 = vmatpush.bf16.msra.mxu3 %v873_v46 }
 0x175   : > { %885 = vmatpush.bf16.msra.mxu3 %v872_v47 }
 0x179   : > { %886 = vmatpush.bf16.msra.mxu3 %v871_v58 }
 0x17d   : > { %887 = vmatpush.bf16.msra.mxu3 %v870_v59 }
 0x1bd   : > { %v545_v60 = vpop.f32.mrf.mxu1 }
 0x1c5   : > { %v547_v50 = vpop.f32.mrf.mxu1 }
 0x1c6   : > { %v610_v61 = vpack.c.bf16 %v547_v50, %v545_v60 }
 0x1c8   : > { %673 = vmatmul.bf16.vlgmr.msra.gmra.mxu2 %v610_v61 }
 0x1d3   : > { %v565_v62 = vpop.f32.mrf.mxu2 }
 0x1db   : > { %v567_v63 = vpop.f32.mrf.mxu2 }
 0x1dc   : > { %v611_v0 = vpack.c.bf16 %v567_v63, %v565_v62 }
 0x1de   : > { %678 = vmatmul.bf16.gmra.mxu2 %v611_v0 }
 0x1e3   : > { %v585_v1 = vpop.f32.mrf.mxu3 }
 0x1eb   : > { %v587_v2 = vpop.f32.mrf.mxu3 }
 0x1ec   : > { %v612_v3 = vpack.c.bf16 %v587_v2, %v585_v1 }
 0x1ed   : > { %v605_v4 = vpop.f32.mrf.mxu1 }
 0x1ee   : > { %683 = vmatmul.bf16.vlgmr.msra.gmra.mxu3 %v612_v3 }
 0x1f5   : > { %v607_v5 = vpop.f32.mrf.mxu1 }
 0x1f6   : > { %v613_v6 = vpack.c.bf16 %v607_v5, %v605_v4 }
 0x1fe   : > { %688 = vmatmul.bf16.gmra.mxu3 %v613_v6 }
 0x24b   : > { %v674_v8 = vpop.f32.mrf.mxu2 }
 0x24c   : > { %v675_v9 = vadd.f32 %v941_v7, %v674_v8 }
 0x24e   : > { %694 = vst [vmem:[%s280_s14] sm:$0xff] %v675_v9 }
 0x253   : > { %v676_v10 = vpop.f32.mrf.mxu2 }
 0x254   : > { %v677_v11 = vadd.f32 %v941_v7, %v676_v10 }
 0x256   : > { %695 = vst [vmem:[%s280_s14 + $0x8] sm:$0xff] %v677_v11 }
 0x261   : > { %v679_v12 = vpop.f32.mrf.mxu2 }
 0x262   : > { %v680_v13 = vadd.f32 %v941_v7, %v679_v12 }
 0x264   : > { %696 = vst [vmem:[%s280_s14 + $0x10] sm:$0xff] %v680_v13 }
 0x269   : > { %v681_v14 = vpop.f32.mrf.mxu2 }
 0x26a   : > { %v682_v15 = vadd.f32 %v941_v7, %v681_v14 }
 0x26c   : > { %697 = vst [vmem:[%s280_s14 + $0x18] sm:$0xff] %v682_v15 }
 0x271   : > { %v684_v16 = vpop.f32.mrf.mxu3 }
 0x272   : > { %v685_v17 = vadd.f32 %v941_v7, %v684_v16 }
 0x274   : > { %698 = vst [vmem:[%s280_s14 + $0x20] sm:$0xff] %v685_v17 }
 0x279   : > { %v686_v18 = vpop.f32.mrf.mxu3 }
 0x27a   : > { %v687_v19 = vadd.f32 %v941_v7, %v686_v18 }
 0x27c   : > { %699 = vst [vmem:[%s280_s14 + $0x28] sm:$0xff] %v687_v19 }
 0x281   : > { %v689_v20 = vpop.f32.mrf.mxu3 }
 0x282   : > { %v690_v21 = vadd.f32 %v941_v7, %v689_v20 }
 0x284   : > { %700 = vst [vmem:[%s280_s14 + $0x30] sm:$0xff] %v690_v21 }
 0x289   : > { %v691_v22 = vpop.f32.mrf.mxu3 }
 0x28a   : > { %v692_v23 = vadd.f32 %v941_v7, %v691_v22 }
 0x28c   : > { %701 = vst [vmem:[%s280_s14 + $0x38] sm:$0xff] %v692_v23 }
 0x28d   : > { %999 = shalt.err (!%p996_p8)
}
 0x28e   : > { %s1041_s10 = smov 128   ;;  %s1042_s14 = smov 8  }
 0x28f   : > { %892 = dma.vmem_to_hbm [thread:$0]  (%p1116_p5), %s717_s19, 1024, %s719_s20, %s703_s26, %s1041_s10, %s1041_s10, %s1042_s14  }
 0x290 PF: > { %p904_p9 = scmp.ge.s32.totalorder %s1038_s24, 2  ;;  %s733_s15 = sand.u32 1, %s1026_s21  }
 0x291   : > { %s734_s16 = scalar_lea.sflag [#allocation4], %s733_s15 }
 0x292   : > { %p899_p10 = pnand %p904_p9, %p1120_p6 }
 0x294   : > { %p900_p11 = pneg %p899_p10 }
 0x296   : > { %1021 = dma.done.wait (%p900_p11), %s734_s16, 1024  }
 0x297   : > { %1023 = vsyncadd (%p900_p11), %s734_s16, 4294966272  ;;  %p17_p12 = scmp.ge.s32.totalorder %s1103_s27, 4   ;;  %s1242_s21 = smov %s1030_s22 }
 0x298   : > { %s1243_s22 = smov %s1034_s23  ;;  %s1244_s23 = smov %s1114_s30 }
 0x299   : > { %s1245_s24 = smov %s1103_s27  ;;  %19 = sbr.rel (!%p17_p12) target bundleno = 4 (0x4), region = 87 }
 0x29e   :  { %740 = vsyncpa [#allocation3], 1 }
 0x29f   :  { %742 = vsyncpa [#allocation3 + $0x1], 1 }
 0x2a0   :  { %743 = vsyncpa [#allocation4], 1 }
 0x2a1   :  { %745 = vsyncpa [#allocation4 + $0x1], 1 }

</bundles_post_ra>
